<compile_context>
chip_gen: v5e
topology: v5e:2x2
jax: 0.10.0
libtpu: 0.0.40
codegen_flags: <defaults>
</compile_context>

<pallas_src>
import functools

import jax
import jax.numpy as jnp
from jax.experimental import pallas as pl
from jax.experimental.pallas import tpu as pltpu

LANES = 128
SUBLANES = 8


def _wtmse_kernel(x_ref, y_ref, o_ref, *, weight, threshold, tile_rows,
                  tiles_per_split, tiles_total, rows, need_mask):
    # Grid = (split, tile).  `split` is the parallel (megacore) axis, `tile` is
    # the sequential reduction axis.  o_ref is this split's (1, 8, 128) f32
    # VMEM accumulator, resident across the `tile` axis.
    i = pl.program_id(1)

    @pl.when(i == 0)
    def _():
        o_ref[...] = jnp.zeros_like(o_ref)

    x = x_ref[...].astype(jnp.float32)
    y = y_ref[...].astype(jnp.float32)
    diff = x - y
    sq = diff * diff
    # mask * diff^2 with a single select (keeps the VALU slot light on v5e).
    val = jnp.where(x < threshold, jnp.float32(weight) * sq, sq)

    if need_mask:
        # Tail / duplicated-tile masking: the index_map clamps the block index
        # so the DMA stays on a valid block; here we zero every element whose
        # global row is past the real data (or whose tile is a clamped
        # duplicate), so out-of-bounds garbage never reaches the accumulator.
        c = pl.program_id(0)
        tile_idx = c * tiles_per_split + i
        row_start = jnp.minimum(tile_idx, tiles_total - 1) * tile_rows
        local_row = jax.lax.broadcasted_iota(jnp.int32, (tile_rows, LANES), 0)
        global_row = row_start + local_row
        valid = (tile_idx < tiles_total) & (global_row < rows)
        val = jnp.where(valid, val, jnp.float32(0.0))

    # Fold the tile down to one vreg-shaped (8, 128) partial using elementwise
    # adds only (VPU); the expensive cross-lane reduce is deferred to the
    # wrapper epilogue.
    partial = jnp.sum(val.reshape(tile_rows // SUBLANES, SUBLANES, LANES), axis=0)
    o_ref[...] += partial[None, :, :]


def weighted_threshold_mse(x, y, weight=40, threshold=0.001,
                           tile_rows=2048, num_splits=2):
    assert x.shape == y.shape, "x and y must have the same shape"
    numel = x.size

    xf = x.reshape(-1)
    yf = y.reshape(-1)
    rem = numel % LANES
    if rem:
        # Rare ragged case (< 128 extra elements): pad both with zeros so the
        # padded positions contribute (x - y)^2 == 0 regardless of the mask.
        pad = LANES - rem
        xf = jnp.concatenate([xf, jnp.zeros((pad,), xf.dtype)])
        yf = jnp.concatenate([yf, jnp.zeros((pad,), yf.dtype)])
    rows = xf.size // LANES
    x2 = xf.reshape(rows, LANES)
    y2 = yf.reshape(rows, LANES)

    # Sublane packing granularity: 8 rows for 32-bit, 16 for 16-bit, 32 for 8-bit.
    itemsize = jnp.dtype(x.dtype).itemsize
    sub = SUBLANES * max(1, 4 // itemsize)
    tile_rows = max(sub, (tile_rows // sub) * sub)
    rows_rounded = ((rows + sub - 1) // sub) * sub
    tile_rows = min(tile_rows, rows_rounded)
    # VMEM budget: 2 inputs x 2 pipeline buffers x (tile_rows*128*itemsize)
    # = 4 MiB at the f32 default (2048 rows) -- safely under v5e's 16 MiB
    # default scoped-VMEM limit and v7x's 64 MiB/TC.

    tiles_total = pl.cdiv(rows, tile_rows)
    nsplit = num_splits if tiles_total >= num_splits else 1
    tiles_per_split = pl.cdiv(tiles_total, nsplit)
    need_mask = (rows % tile_rows != 0) or (nsplit * tiles_per_split != tiles_total)

    def in_map(c, i):
        t = c * tiles_per_split + i
        if need_mask:
            t = jnp.minimum(t, tiles_total - 1)
        return (t, 0)

    kernel = functools.partial(
        _wtmse_kernel,
        weight=float(weight), threshold=float(threshold),
        tile_rows=tile_rows, tiles_per_split=tiles_per_split,
        tiles_total=tiles_total, rows=rows, need_mask=need_mask)

    partials = pl.pallas_call(
        kernel,
        out_shape=jax.ShapeDtypeStruct((nsplit, SUBLANES, LANES), jnp.float32),
        grid_spec=pltpu.PrefetchScalarGridSpec(
            num_scalar_prefetch=0,
            grid=(nsplit, tiles_per_split),
            in_specs=[
                pl.BlockSpec((tile_rows, LANES), in_map),
                pl.BlockSpec((tile_rows, LANES), in_map),
            ],
            out_specs=pl.BlockSpec((1, SUBLANES, LANES), lambda c, i: (c, 0, 0)),
        ),
        compiler_params=pltpu.CompilerParams(
            dimension_semantics=("parallel", "arbitrary")),
    )(x2, y2)

    return jnp.sum(partials) / jnp.float32(numel)


def _reference(x, y, weight=40, threshold=0.001):
    xf = x.astype(jnp.float32)
    yf = y.astype(jnp.float32)
    mask = jnp.where(xf < threshold, jnp.float32(weight), jnp.float32(1.0))
    return jnp.sum(mask * (xf - yf) ** 2) / x.size


if __name__ == "__main__":
    # Primary check: small NCHW shapes consistent with the module's usage.
    kx, ky = jax.random.split(jax.random.PRNGKey(0))
    x = jax.random.uniform(kx, (2, 4, 16, 16), dtype=jnp.float32) - 0.1
    y = jax.random.uniform(ky, (2, 4, 16, 16), dtype=jnp.float32)
    out = jax.block_until_ready(weighted_threshold_mse(x, y))
    ref = _reference(x, y)
    assert jnp.allclose(out, ref, rtol=1e-4, atol=1e-6), (out, ref)

    # Secondary check: larger slab exercising the 2-way parallel split
    # (tiles_total >= 2) with evenly divisible tiles.
    kx2, ky2 = jax.random.split(jax.random.PRNGKey(1))
    xb = jax.random.uniform(kx2, (8, 8, 64, 128), dtype=jnp.float32) - 0.1
    yb = jax.random.uniform(ky2, (8, 8, 64, 128), dtype=jnp.float32)
    out_b = jax.block_until_ready(weighted_threshold_mse(xb, yb))
    ref_b = _reference(xb, yb)
    assert jnp.allclose(out_b, ref_b, rtol=1e-4, atol=1e-6), (out_b, ref_b)

    # Tertiary check: odd tile size forces the in-kernel tail mask and the
    # clamped duplicate-tile path on the parallel split.
    out_c = jax.block_until_ready(weighted_threshold_mse(xb, yb, tile_rows=96))
    assert jnp.allclose(out_c, ref_b, rtol=1e-4, atol=1e-6), (out_c, ref_b)

    print("KERNEL_OK")
</pallas_src>

<mosaic_0001>
module attributes {stable_mosaic.version = 11 : i64} {
  func.func @_wtmse_kernel(%arg0: i32, %arg1: i32, %arg2: memref<16x128xf32, #tpu.memory_space<vmem>>, %arg3: memref<16x128xf32, #tpu.memory_space<vmem>>, %arg4: memref<1x8x128xf32, #tpu.memory_space<vmem>>) attributes {dimension_semantics = [#tpu.dimension_semantics<parallel>, #tpu.dimension_semantics<arbitrary>], iteration_bounds = array<i64: 1, 1>, scalar_prefetch = 0 : i64, scratch_operands = 0 : i64, tpu.core_type = #tpu.core_type<tc>, window_params = [{transform_indices = @transform_0, window_bounds = array<i64: 16, 128>}, {transform_indices = @transform_1, window_bounds = array<i64: 16, 128>}, {transform_indices = @transform_2, window_bounds = array<i64: 1, 8, 128>}]} {
    %c0_i32 = arith.constant 0 : i32
    %0 = arith.cmpi eq, %arg1, %c0_i32 : i32
    %1 = arith.extui %0 : i1 to i32
    %c0_i32_0 = arith.constant 0 : i32
    %2 = arith.cmpi ne, %1, %c0_i32_0 : i32
    scf.if %2 {
      %cst_12 = arith.constant 0.000000e+00 : f32
      %18 = vector.broadcast %cst_12 : f32 to vector<1x8x128xf32>
      %c0_13 = arith.constant 0 : index
      %c0_14 = arith.constant 0 : index
      %c0_15 = arith.constant 0 : index
      %19 = vector.load %arg4[%c0_13, %c0_14, %c0_15] : memref<1x8x128xf32, #tpu.memory_space<vmem>>, vector<1x8x128xf32>
      tpu.vector_store %arg4[%c0_13, %c0_14, %c0_15], %18 {strides = array<i32>} : memref<1x8x128xf32, #tpu.memory_space<vmem>>, vector<1x8x128xf32>,
    } else {
    }
    %c0 = arith.constant 0 : index
    %c0_1 = arith.constant 0 : index
    %3 = vector.load %arg2[%c0, %c0_1] : memref<16x128xf32, #tpu.memory_space<vmem>>, vector<16x128xf32>
    %c0_2 = arith.constant 0 : index
    %c0_3 = arith.constant 0 : index
    %4 = vector.load %arg3[%c0_2, %c0_3] : memref<16x128xf32, #tpu.memory_space<vmem>>, vector<16x128xf32>
    %5 = arith.subf %3, %4 : vector<16x128xf32>
    %6 = arith.mulf %5, %5 : vector<16x128xf32>
    %cst = arith.constant 1.000000e-03 : f32
    %7 = vector.broadcast %cst : f32 to vector<16x128xf32>
    %8 = arith.cmpf olt, %3, %7 : vector<16x128xf32>
    %cst_4 = arith.constant 4.000000e+01 : f32
    %9 = vector.broadcast %cst_4 : f32 to vector<16x128xf32>
    %10 = arith.mulf %9, %6 : vector<16x128xf32>
    %11 = arith.select %8, %10, %6 : vector<16x128xi1>, vector<16x128xf32>
    %12 = vector.shape_cast %11 : vector<16x128xf32> to vector<2x8x128xf32>
    %cst_5 = arith.constant dense<0.000000e+00> : vector<8x128xf32>
    %13 = vector.multi_reduction <add>, %12, %cst_5 [0] : vector<2x8x128xf32> to vector<8x128xf32>
    %c0_6 = arith.constant 0 : index
    %c0_7 = arith.constant 0 : index
    %c0_8 = arith.constant 0 : index
    %14 = vector.load %arg4[%c0_6, %c0_7, %c0_8] : memref<1x8x128xf32, #tpu.memory_space<vmem>>, vector<1x8x128xf32>
    %15 = vector.shape_cast %13 : vector<8x128xf32> to vector<1x8x128xf32>
    %16 = arith.addf %14, %15 : vector<1x8x128xf32>
    %c0_9 = arith.constant 0 : index
    %c0_10 = arith.constant 0 : index
    %c0_11 = arith.constant 0 : index
    %17 = vector.load %arg4[%c0_9, %c0_10, %c0_11] : memref<1x8x128xf32, #tpu.memory_space<vmem>>, vector<1x8x128xf32>
    tpu.vector_store %arg4[%c0_9, %c0_10, %c0_11], %16 {strides = array<i32>} : memref<1x8x128xf32, #tpu.memory_space<vmem>>, vector<1x8x128xf32>,
    return
  }
  func.func @transform_0(%arg0: i32, %arg1: i32) -> (i32, i32) {
    %c1_i32 = arith.constant 1 : i32
    %0 = arith.muli %arg0, %c1_i32 : i32
    %1 = arith.addi %0, %arg1 : i32
    %c0_i32 = arith.constant 0 : i32
    %c0_i32_0 = arith.constant 0 : i32
    return %1, %c0_i32 : i32, i32
  }
  func.func @transform_1(%arg0: i32, %arg1: i32) -> (i32, i32) {
    %c1_i32 = arith.constant 1 : i32
    %0 = arith.muli %arg0, %c1_i32 : i32
    %1 = arith.addi %0, %arg1 : i32
    %c0_i32 = arith.constant 0 : i32
    %c0_i32_0 = arith.constant 0 : i32
    return %1, %c0_i32 : i32, i32
  }
  func.func @transform_2(%arg0: i32, %arg1: i32) -> (i32, i32, i32) {
    %c0_i32 = arith.constant 0 : i32
    %c0_i32_0 = arith.constant 0 : i32
    %c0_i32_1 = arith.constant 0 : i32
    return %arg0, %c0_i32, %c0_i32_0 : i32, i32, i32
  }
}

</mosaic_0001>

<bundles_post_ra>
// kernel: tpu_custom_call.1
= control target key start
LH: loop header
LB: loop body
LE: loop exit
PB: predicated region body
PF: predicated region fallthrough
CT: control target
= control target key end

     0   :  { %7 = vsyncpa [#allocation3], 0  ;;  %s210_s0 = inlined_call_operand.hbm [shape: f32[16,128], index: 0, kind: input, shape index: {}]   ;;  %s211_s1 = inlined_call_operand.hbm [shape: f32[16,128], index: 1, kind: input, shape index: {}]   ;;  %s212_s2 = inlined_call_operand.hbm [shape: f32[1,8,128], index: 2, kind: output, shape index: {}]  }
   0x1   :  { %8 = vsyncpa [#allocation6], 0 }
   0x2   :  { %9 = vsyncpa [#allocation4], 0  ;;  %s18_s11 = sshll.u32 %s210_s0, 4  ;;  %s181_s12 = smov [#allocation2]   ;;  %s19_s11 = int_to_ptr.hbm [resolvable:$true] %s18_s11 }
   0x3   :  { %s20_s13 = sshll.u32 %s181_s12, 4  ;;  %s35_s16 = sshll.u32 %s211_s1, 4  ;;  %s21_s13 = int_to_ptr.vmem [resolvable:$true] %s20_s13  ;;  %s36_s16 = int_to_ptr.hbm [resolvable:$true] %s35_s16 }
   0x4   :  { %s182_s17 = smov 128   ;;  %s183_s18 = smov 8  }
   0x5   :  { %26 = dma.hbm_to_vmem [thread:$0]  %s19_s11, 256, %s21_s13, [#allocation3], %s182_s17, %s182_s17, %s183_s18  }
   0x6   :  { %s184_s19 = smov [#allocation5]  }
   0x7   :  { %s37_s20 = sshll.u32 %s184_s19, 4  ;;  %s38_s20 = int_to_ptr.vmem [resolvable:$true] %s37_s20 }
   0x8   :  { %43 = dma.hbm_to_vmem [thread:$0]  %s36_s16, 256, %s38_s20, [#allocation6], %s182_s17, %s182_s17, %s183_s18  }
   0x9   :  { %175 = dma.done.wait [#allocation3], 256  }
   0xa   :  { %176 = vsyncadd [#allocation3], 4294967040 }
   0xb   :  { %177 = dma.done.wait [#allocation6], 256  }
   0xc   :  { %178 = vsyncadd [#allocation6], 4294967040  ;;  %v61_v0 = vld [vmem:[#allocation2] sm:$0xff]  ;;  %v62_v1 = vld [vmem:[#allocation2 + $0x8] sm:$0xff]  ;;  %s185_s0 = smov [#allocation7]   ;;  %s86_s23 = sshll.u32 %s212_s2, 4  ;;  %s87_s23 = int_to_ptr.hbm [resolvable:$true] %s86_s23 }
   0xd   :  { %v63_v2 = vld [vmem:[#allocation5] sm:$0xff]  ;;  %v64_v3 = vld [vmem:[#allocation5 + $0x8] sm:$0xff]  ;;  %vm69_vm0 = vcmp.lt.f32.partialorder %v61_v0, 0.001  ;;  %vm70_vm1 = vcmp.lt.f32.partialorder %v62_v1, 0.001 }
   0xe   :  { %v65_v4 = vsub.f32 %v61_v0, %v63_v2  ;;  %v66_v5 = vsub.f32 %v62_v1, %v64_v3  ;;  %s84_s1 = sshll.u32 %s185_s0, 4  ;;  %s85_s1 = int_to_ptr.vmem [resolvable:$true] %s84_s1 }
  0x10   :  { %v67_v6 = vmul.f32 %v65_v4, %v65_v4  ;;  %v68_v7 = vmul.f32 %v66_v5, %v66_v5 }
  0x12   :  { %v71_v8 = vmul.f32 40.0, %v67_v6  ;;  %v72_v9 = vmul.f32 40.0, %v68_v7 }
  0x14   :  { %v73_v10 = vsel %vm69_vm0, %v71_v8, %v67_v6  ;;  %v74_v11 = vsel %vm70_vm1, %v72_v9, %v68_v7 }
  0x15   :  { %v75_v12 = vadd.f32 %v74_v11, %v73_v10 }
  0x17   :  { %78 = vst [vmem:[#allocation7] sm:$0xff] %v75_v12 }
  0x18   :  { %89 = dma.vmem_to_hbm [thread:$0]  %s85_s1, 128, %s87_s23, [#allocation4]  }
  0x19   :  { %179 = dma.done.wait [#allocation4], 128  }
  0x1a   :  { %180 = vsyncadd [#allocation4], 4294967168 }
  0x1b   :  { %94 = vsyncpa [#allocation3], 1 }
  0x1c   :  { %95 = vsyncpa [#allocation6], 1 }
  0x1d   :  { %96 = vsyncpa [#allocation4], 1 }

</bundles_post_ra>
